<compile_context>
chip_gen: v7x
topology: tpu7x:2x2x1
jax: 0.10.0
libtpu: 0.0.40
codegen_flags: <defaults>
</compile_context>

<pallas_src>
import math
import numpy as np
import jax
import jax.numpy as jnp
from jax.experimental import pallas as pl
from jax.experimental.pallas import tpu as pltpu

BN_EPS = 1e-5
LANE = 128
_VMEM_LIMIT = 48 * 1024 * 1024      # safe on v7x (64 MiB/TC); fine on v5e/v6e
_FUSED_BUDGET = 40 * 1024 * 1024    # resident-data budget for the fused path


def _round_up(x, m):
    return ((x + m - 1) // m) * m


def _pad2(x, rows, cols):
    return jnp.pad(x, ((0, rows - x.shape[0]), (0, cols - x.shape[1])))


# ----------------------- fused two-layer kernel (small graphs) ---------------
def _fused_gcn_kernel(a_ref, x_ref, w1t_ref, b1_ref, w2t_ref, b2_ref,
                      o_ref, h1_ref):
    """grid = (phase, row_tile).  phase 0: H1 = (A@X)@W1^T + b1 into VMEM slab.
    phase 1: out = (A@H1)@W2^T + b2 (BN pre-folded into W2/b2)."""
    p = pl.program_id(0)
    j = pl.program_id(1)
    tm = a_ref.shape[0]

    @pl.when(p == 0)
    def _layer1():
        agg = jnp.dot(a_ref[...], x_ref[...],
                      preferred_element_type=jnp.float32)
        h1 = jnp.dot(agg, w1t_ref[...],
                     preferred_element_type=jnp.float32) + b1_ref[...]
        row0 = pl.multiple_of(j * tm, tm)
        h1_ref[pl.ds(row0, tm), :] = h1.astype(h1_ref.dtype)
        # dropout is identity in eval mode
        o_ref[...] = jnp.zeros_like(o_ref)   # deterministic placeholder write

    @pl.when(p == 1)
    def _layer2():
        agg = jnp.dot(a_ref[...], h1_ref[...],
                      preferred_element_type=jnp.float32)
        o_ref[...] = (jnp.dot(agg, w2t_ref[...],
                              preferred_element_type=jnp.float32)
                      + b2_ref[...]).astype(o_ref.dtype)


def _fused_forward(a_bf, x_bf, w1t, b1, w2t, b2, *, n_p, tm, out_dtype):
    f_in_p = x_bf.shape[1]
    hid_p = w1t.shape[1]
    f_out_p = w2t.shape[1]
    grid = (2, n_p // tm)

    flops = (2 * n_p * n_p * (f_in_p + hid_p)
             + 2 * n_p * (f_in_p * hid_p + hid_p * f_out_p))
    bytes_accessed = (2 * a_bf.size * a_bf.dtype.itemsize   # A streamed per phase
                      + x_bf.size * x_bf.dtype.itemsize
                      + w1t.size * 4 + w2t.size * 4 + b1.size * 4 + b2.size * 4
                      + n_p * f_out_p * jnp.dtype(out_dtype).itemsize)

    return pl.pallas_call(
        _fused_gcn_kernel,
        out_shape=jax.ShapeDtypeStruct((n_p, f_out_p), out_dtype),
        grid_spec=pltpu.PrefetchScalarGridSpec(
            num_scalar_prefetch=0,
            grid=grid,
            in_specs=[
                pl.BlockSpec((tm, n_p), lambda p, j: (j, 0)),       # A row tile
                pl.BlockSpec((n_p, f_in_p), lambda p, j: (0, 0)),   # X resident
                pl.BlockSpec((f_in_p, hid_p), lambda p, j: (0, 0)), # W1^T (f32)
                pl.BlockSpec((1, hid_p), lambda p, j: (0, 0)),      # b1
                pl.BlockSpec((hid_p, f_out_p), lambda p, j: (0, 0)),# W2^T (f32)
                pl.BlockSpec((1, f_out_p), lambda p, j: (0, 0)),    # b2
            ],
            out_specs=pl.BlockSpec((tm, f_out_p), lambda p, j: (j, 0)),
            scratch_shapes=[pltpu.VMEM((n_p, hid_p), jnp.bfloat16)],  # H1 slab
        ),
        compiler_params=pltpu.CompilerParams(
            # phase 1 needs ALL H1 rows from phase 0, so both axes must stay
            # sequential on one core ("arbitrary"); fine at fused problem sizes.
            dimension_semantics=("arbitrary", "arbitrary"),
            vmem_limit_bytes=_VMEM_LIMIT,
        ),
        cost_estimate=pl.CostEstimate(flops=flops, transcendentals=0,
                                      bytes_accessed=bytes_accessed),
    )(a_bf, x_bf, w1t, b1, w2t, b2)


# ----------------------- tiled per-layer kernel (large graphs) ---------------
def _gcn_layer_kernel(a_ref, x_ref, wt_ref, b_ref, o_ref, acc_ref):
    """out[i_tile] = (sum_k A[i_tile, k_tile] @ X[k_tile]) @ W^T + b."""
    k = pl.program_id(1)

    @pl.when(k == 0)
    def _init():
        acc_ref[...] = jnp.zeros_like(acc_ref)

    acc_ref[...] += jnp.dot(a_ref[...], x_ref[...],
                            preferred_element_type=jnp.float32)

    @pl.when(k == pl.num_programs(1) - 1)
    def _finalize():
        # small W matmul kept in f32 for precision (not the bottleneck)
        o_ref[...] = (jnp.dot(acc_ref[...], wt_ref[...],
                              preferred_element_type=jnp.float32)
                      + b_ref[...]).astype(o_ref.dtype)


def _gcn_layer_tiled(a, x, wt, b, *, out_dtype, tile_m=1024, tile_k=512):
    m, kdim = a.shape
    f_in = x.shape[1]
    f_out = wt.shape[1]

    tm = min(tile_m, _round_up(m, LANE))
    tk = min(tile_k, _round_up(kdim, LANE))
    m_p = _round_up(m, tm)
    k_p = _round_up(kdim, tk)
    # v7x megacore: keep at least 2 row tiles so ("parallel", ...) can shard.
    if m_p // tm < 2 and m_p >= 2 * LANE:
        tm = m_p // 2
    if (m_p, k_p) != (m, kdim):
        a = jnp.pad(a, ((0, m_p - m), (0, k_p - kdim)))
    if k_p != x.shape[0]:
        x = jnp.pad(x, ((0, k_p - x.shape[0]), (0, 0)))

    grid = (m_p // tm, k_p // tk)
    row_tiles = grid[0]

    flops = 2 * m_p * k_p * f_in + 2 * m_p * f_in * f_out
    bytes_accessed = (a.size * a.dtype.itemsize
                      + row_tiles * x.size * x.dtype.itemsize   # X re-streamed
                      + wt.size * wt.dtype.itemsize + b.size * b.dtype.itemsize
                      + m_p * f_out * jnp.dtype(out_dtype).itemsize)

    out = pl.pallas_call(
        _gcn_layer_kernel,
        out_shape=jax.ShapeDtypeStruct((m_p, f_out), out_dtype),
        grid_spec=pltpu.PrefetchScalarGridSpec(
            num_scalar_prefetch=0,
            grid=grid,
            in_specs=[
                pl.BlockSpec((tm, tk), lambda i, k: (i, k)),        # A tile
                pl.BlockSpec((tk, f_in), lambda i, k: (k, 0)),      # X k-tile
                pl.BlockSpec((f_in, f_out), lambda i, k: (0, 0)),   # W^T resident
                pl.BlockSpec((1, f_out), lambda i, k: (0, 0)),      # bias resident
            ],
            out_specs=pl.BlockSpec((tm, f_out), lambda i, k: (i, 0)),
            scratch_shapes=[pltpu.VMEM((tm, f_in), jnp.float32)],
        ),
        compiler_params=pltpu.CompilerParams(
            dimension_semantics=("parallel", "arbitrary"),
            vmem_limit_bytes=_VMEM_LIMIT,
        ),
        cost_estimate=pl.CostEstimate(flops=flops, transcendentals=0,
                                      bytes_accessed=bytes_accessed),
    )(a, x, wt, b)
    return out[:m]


# ------------------------------ forward wrapper -------------------------------
def graphnn_forward(ahat, emb, w1, b1, w2, b2, gamma, beta,
                    running_mean, running_var):
    n, ninp = emb.shape
    hidden = w1.shape[0]
    f_in_p = _round_up(ninp, LANE)
    hid_p = _round_up(hidden, LANE)

    # Fold eval-mode BatchNorm1d (affine + running stats) into layer 2.
    bn_scale = gamma / jnp.sqrt(running_var + BN_EPS)
    bn_shift = beta - running_mean * bn_scale

    # Layer 1: H1 = (Ahat @ X) @ W1^T + b1
    w1t = _pad2(jnp.transpose(w1), f_in_p, hid_p).astype(jnp.float32)
    b1p = jnp.pad(b1, (0, hid_p - hidden)).reshape(1, -1).astype(jnp.float32)
    # Layer 2 (BN folded): out = (Ahat @ H1) @ (W2^T * s) + (b2 * s + shift)
    w2t = _pad2(jnp.transpose(w2) * bn_scale[None, :],
                hid_p, f_in_p).astype(jnp.float32)
    b2p = jnp.pad(b2 * bn_scale + bn_shift,
                  (0, f_in_p - ninp)).reshape(1, -1).astype(jnp.float32)

    # Pad node dim to a lane/tile multiple; padded rows/cols of Ahat are zero,
    # so extra rows only carry bias values and are sliced off at the end.
    n_128 = _round_up(n, LANE)
    tm = min(512, n_128)
    n_p = _round_up(n_128, tm)

    def _fused_bytes(tm_, n_p_):
        return (2 * tm_ * n_p_ * 2            # A row tile, double-buffered bf16
                + n_p_ * f_in_p * 2           # X resident bf16
                + n_p_ * hid_p * 2            # H1 scratch bf16
                + (f_in_p * hid_p + hid_p * f_in_p) * 4   # weights f32
                + 2 * tm_ * f_in_p * 4)       # out tile double-buffered f32

    while tm > LANE and _fused_bytes(tm, n_p) > _FUSED_BUDGET:
        tm //= 2
        n_p = _round_up(n_128, tm)

    a_bf = ahat if ahat.dtype == jnp.bfloat16 else ahat.astype(jnp.bfloat16)
    if n_p != n:
        a_bf = jnp.pad(a_bf, ((0, n_p - n), (0, n_p - n)))
    x_bf = _pad2(emb, n_p, f_in_p).astype(jnp.bfloat16)

    if _fused_bytes(tm, n_p) <= _FUSED_BUDGET:
        out = _fused_forward(a_bf, x_bf, w1t, b1p, w2t, b2p,
                             n_p=n_p, tm=tm, out_dtype=jnp.float32)
    else:
        h1 = _gcn_layer_tiled(a_bf, x_bf, w1t, b1p, out_dtype=jnp.bfloat16)
        out = _gcn_layer_tiled(a_bf, h1, w2t, b2p, out_dtype=jnp.float32)
    return out[:n, :ninp]


# ------------------------------ JAX glue --------------------------------------
def normalized_adjacency(edge_index, num_nodes, *, dtype=jnp.bfloat16):
    """Dense D^{-1/2} (A + I) D^{-1/2}, matching PyG GCNConv normalization.
    Built directly in bf16 so the big N^2 array is never re-cast."""
    src = edge_index[0]
    dst = edge_index[1]
    loop = jnp.arange(num_nodes, dtype=edge_index.dtype)
    src = jnp.concatenate([src, loop])
    dst = jnp.concatenate([dst, loop])
    a = jnp.zeros((num_nodes, num_nodes), jnp.float32).at[dst, src].add(1.0)
    deg = jnp.zeros((num_nodes,), jnp.float32).at[dst].add(1.0)
    dinv = jnp.where(deg > 0, jax.lax.rsqrt(deg), 0.0)
    return (a * dinv[:, None] * dinv[None, :]).astype(dtype)


def reference_forward(ahat, emb, w1, b1, w2, b2, gamma, beta, rmean, rvar):
    a = ahat.astype(jnp.float32)
    h1 = a @ (emb @ w1.T) + b1
    h2 = a @ (h1 @ w2.T) + b2
    return (h2 - rmean) / jnp.sqrt(rvar + BN_EPS) * gamma + beta


# -------------------------------- main -----------------------------------------
if __name__ == "__main__":
    ntoken, ninp = 128, 32
    hidden = 2 * ninp
    num_edges = 256

    key = jax.random.PRNGKey(0)
    k_emb, k_w1, k_w2, k_e = jax.random.split(key, 4)

    # Embedding weight: xavier_normal_
    emb_std = math.sqrt(2.0 / (ninp + ntoken))
    emb = emb_std * jax.random.normal(k_emb, (ntoken, ninp), jnp.float32)

    # GCNConv weights: glorot-uniform, PyTorch layout (out_features, in_features)
    def glorot(k, out_f, in_f):
        bound = math.sqrt(6.0 / (in_f + out_f))
        return jax.random.uniform(k, (out_f, in_f), jnp.float32, -bound, bound)

    w1 = glorot(k_w1, hidden, ninp)
    b1 = jnp.zeros((hidden,), jnp.float32)
    w2 = glorot(k_w2, ninp, hidden)
    b2 = jnp.zeros((ninp,), jnp.float32)

    # BatchNorm1d params and running stats (fresh-module defaults)
    gamma = jnp.ones((ninp,), jnp.float32)
    beta = jnp.zeros((ninp,), jnp.float32)
    running_mean = jnp.zeros((ninp,), jnp.float32)
    running_var = jnp.ones((ninp,), jnp.float32)

    # Deterministic random graph, made undirected
    src = jax.random.randint(k_e, (num_edges,), 0, ntoken, jnp.int32)
    dst = jax.random.randint(jax.random.fold_in(k_e, 1), (num_edges,), 0,
                             ntoken, jnp.int32)
    edge_index = jnp.stack([jnp.concatenate([src, dst]),
                            jnp.concatenate([dst, src])], axis=0)

    ahat = normalized_adjacency(edge_index, ntoken)          # bf16 at source

    fwd = jax.jit(graphnn_forward)
    out = fwd(ahat, emb, w1, b1, w2, b2, gamma, beta,
              running_mean, running_var)
    out = jax.block_until_ready(out)

    ref = reference_forward(ahat, emb, w1, b1, w2, b2, gamma, beta,
                            running_mean, running_var)
    np.testing.assert_allclose(np.asarray(out), np.asarray(ref),
                               rtol=2e-2, atol=2e-2)  # bf16 MXU inputs
    assert out.shape == (ntoken, ninp) and out.dtype == jnp.float32

    print("KERNEL_OK")
</pallas_src>

<mosaic_0001>
module attributes {stable_mosaic.version = 11 : i64} {
  func.func @_fused_gcn_kernel(%arg0: i32, %arg1: i32, %arg2: memref<128x128xbf16, #tpu.memory_space<vmem>>, %arg3: memref<128x128xbf16, #tpu.memory_space<vmem>>, %arg4: memref<128x128xf32, #tpu.memory_space<vmem>>, %arg5: memref<1x128xf32, #tpu.memory_space<vmem>>, %arg6: memref<128x128xf32, #tpu.memory_space<vmem>>, %arg7: memref<1x128xf32, #tpu.memory_space<vmem>>, %arg8: memref<128x128xf32, #tpu.memory_space<vmem>>, %arg9: memref<128x128xbf16, #tpu.memory_space<vmem>>) attributes {dimension_semantics = [#tpu.dimension_semantics<arbitrary>, #tpu.dimension_semantics<arbitrary>], iteration_bounds = array<i64: 2, 1>, scalar_prefetch = 0 : i64, scratch_operands = 1 : i64, tpu.core_type = #tpu.core_type<tc>, window_params = [{transform_indices = @transform_0, window_bounds = array<i64: 128, 128>}, {pipeline_mode = #tpu.pipeline_mode<synchronous>, transform_indices = @transform_1, window_bounds = array<i64: 128, 128>}, {pipeline_mode = #tpu.pipeline_mode<synchronous>, transform_indices = @transform_2, window_bounds = array<i64: 128, 128>}, {pipeline_mode = #tpu.pipeline_mode<synchronous>, transform_indices = @transform_3, window_bounds = array<i64: 1, 128>}, {pipeline_mode = #tpu.pipeline_mode<synchronous>, transform_indices = @transform_4, window_bounds = array<i64: 128, 128>}, {pipeline_mode = #tpu.pipeline_mode<synchronous>, transform_indices = @transform_5, window_bounds = array<i64: 1, 128>}, {transform_indices = @transform_6, window_bounds = array<i64: 128, 128>}]} {
    %c0_i32 = arith.constant 0 : i32
    %0 = arith.cmpi eq, %arg0, %c0_i32 : i32
    %1 = arith.extui %0 : i1 to i32
    %c0_i32_0 = arith.constant 0 : i32
    %2 = arith.cmpi ne, %1, %c0_i32_0 : i32
    scf.if %2 {
      %c0 = arith.constant 0 : index
      %c0_2 = arith.constant 0 : index
      %6 = vector.load %arg2[%c0, %c0_2] : memref<128x128xbf16, #tpu.memory_space<vmem>>, vector<128x128xbf16>
      %c0_3 = arith.constant 0 : index
      %c0_4 = arith.constant 0 : index
      %7 = vector.load %arg3[%c0_3, %c0_4] : memref<128x128xbf16, #tpu.memory_space<vmem>>, vector<128x128xbf16>
      %cst = arith.constant dense<0.000000e+00> : vector<128x128xf32>
      %8 = tpu.matmul %6, %7, %cst {dimension_numbers = #tpu.dot_dimension_numbers<[1], [0], [0], [1], [0, 0, 1, 1], [], []>} : vector<128x128xbf16>, vector<128x128xbf16>, vector<128x128xf32> -> vector<128x128xf32>
      %c0_5 = arith.constant 0 : index
      %c0_6 = arith.constant 0 : index
      %9 = vector.load %arg4[%c0_5, %c0_6] : memref<128x128xf32, #tpu.memory_space<vmem>>, vector<128x128xf32>
      %cst_7 = arith.constant dense<0.000000e+00> : vector<128x128xf32>
      %10 = tpu.matmul %8, %9, %cst_7 {dimension_numbers = #tpu.dot_dimension_numbers<[1], [0], [0], [1], [0, 0, 1, 1], [], []>} : vector<128x128xf32>, vector<128x128xf32>, vector<128x128xf32> -> vector<128x128xf32>
      %c0_8 = arith.constant 0 : index
      %c0_9 = arith.constant 0 : index
      %11 = vector.load %arg5[%c0_8, %c0_9] : memref<1x128xf32, #tpu.memory_space<vmem>>, vector<1x128xf32>
      %12 = vector.broadcast %11 : vector<1x128xf32> to vector<128x128xf32>
      %13 = arith.addf %10, %12 : vector<128x128xf32>
      %c128_i32 = arith.constant 128 : i32
      %14 = arith.muli %arg1, %c128_i32 : i32
      %15 = tpu.assume_multiple %14, 128 : i32
      %16 = arith.truncf %13 : vector<128x128xf32> to vector<128x128xbf16>
      %17 = arith.index_cast %15 : i32 to index
      %c0_10 = arith.constant 0 : index
      %18 = vector.load %arg9[%17, %c0_10] : memref<128x128xbf16, #tpu.memory_space<vmem>>, vector<128x128xbf16>
      tpu.vector_store %arg9[%17, %c0_10], %16 {strides = array<i32>} : memref<128x128xbf16, #tpu.memory_space<vmem>>, vector<128x128xbf16>,
      %cst_11 = arith.constant 0.000000e+00 : f32
      %19 = vector.broadcast %cst_11 : f32 to vector<128x128xf32>
      %c0_12 = arith.constant 0 : index
      %c0_13 = arith.constant 0 : index
      %20 = vector.load %arg8[%c0_12, %c0_13] : memref<128x128xf32, #tpu.memory_space<vmem>>, vector<128x128xf32>
      tpu.vector_store %arg8[%c0_12, %c0_13], %19 {strides = array<i32>} : memref<128x128xf32, #tpu.memory_space<vmem>>, vector<128x128xf32>,
    } else {
    }
    %c1_i32 = arith.constant 1 : i32
    %3 = arith.cmpi eq, %arg0, %c1_i32 : i32
    %4 = arith.extui %3 : i1 to i32
    %c0_i32_1 = arith.constant 0 : i32
    %5 = arith.cmpi ne, %4, %c0_i32_1 : i32
    scf.if %5 {
      %c0 = arith.constant 0 : index
      %c0_2 = arith.constant 0 : index
      %6 = vector.load %arg2[%c0, %c0_2] : memref<128x128xbf16, #tpu.memory_space<vmem>>, vector<128x128xbf16>
      %c0_3 = arith.constant 0 : index
      %c0_4 = arith.constant 0 : index
      %7 = vector.load %arg9[%c0_3, %c0_4] : memref<128x128xbf16, #tpu.memory_space<vmem>>, vector<128x128xbf16>
      %cst = arith.constant dense<0.000000e+00> : vector<128x128xf32>
      %8 = tpu.matmul %6, %7, %cst {dimension_numbers = #tpu.dot_dimension_numbers<[1], [0], [0], [1], [0, 0, 1, 1], [], []>} : vector<128x128xbf16>, vector<128x128xbf16>, vector<128x128xf32> -> vector<128x128xf32>
      %c0_5 = arith.constant 0 : index
      %c0_6 = arith.constant 0 : index
      %9 = vector.load %arg6[%c0_5, %c0_6] : memref<128x128xf32, #tpu.memory_space<vmem>>, vector<128x128xf32>
      %cst_7 = arith.constant dense<0.000000e+00> : vector<128x128xf32>
      %10 = tpu.matmul %8, %9, %cst_7 {dimension_numbers = #tpu.dot_dimension_numbers<[1], [0], [0], [1], [0, 0, 1, 1], [], []>} : vector<128x128xf32>, vector<128x128xf32>, vector<128x128xf32> -> vector<128x128xf32>
      %c0_8 = arith.constant 0 : index
      %c0_9 = arith.constant 0 : index
      %11 = vector.load %arg7[%c0_8, %c0_9] : memref<1x128xf32, #tpu.memory_space<vmem>>, vector<1x128xf32>
      %12 = vector.broadcast %11 : vector<1x128xf32> to vector<128x128xf32>
      %13 = arith.addf %10, %12 : vector<128x128xf32>
      %c0_10 = arith.constant 0 : index
      %c0_11 = arith.constant 0 : index
      %14 = vector.load %arg8[%c0_10, %c0_11] : memref<128x128xf32, #tpu.memory_space<vmem>>, vector<128x128xf32>
      tpu.vector_store %arg8[%c0_10, %c0_11], %13 {strides = array<i32>} : memref<128x128xf32, #tpu.memory_space<vmem>>, vector<128x128xf32>,
    } else {
    }
    return
  }
  func.func @transform_0(%arg0: i32, %arg1: i32) -> (i32, i32) {
    %c0_i32 = arith.constant 0 : i32
    %c0_i32_0 = arith.constant 0 : i32
    return %arg1, %c0_i32 : i32, i32
  }
  func.func @transform_1(%arg0: i32, %arg1: i32) -> (i32, i32) {
    %c0_i32 = arith.constant 0 : i32
    %c0_i32_0 = arith.constant 0 : i32
    %c0_i32_1 = arith.constant 0 : i32
    return %c0_i32, %c0_i32_0 : i32, i32
  }
  func.func @transform_2(%arg0: i32, %arg1: i32) -> (i32, i32) {
    %c0_i32 = arith.constant 0 : i32
    %c0_i32_0 = arith.constant 0 : i32
    %c0_i32_1 = arith.constant 0 : i32
    return %c0_i32, %c0_i32_0 : i32, i32
  }
  func.func @transform_3(%arg0: i32, %arg1: i32) -> (i32, i32) {
    %c0_i32 = arith.constant 0 : i32
    %c0_i32_0 = arith.constant 0 : i32
    %c0_i32_1 = arith.constant 0 : i32
    return %c0_i32, %c0_i32_0 : i32, i32
  }
  func.func @transform_4(%arg0: i32, %arg1: i32) -> (i32, i32) {
    %c0_i32 = arith.constant 0 : i32
    %c0_i32_0 = arith.constant 0 : i32
    %c0_i32_1 = arith.constant 0 : i32
    return %c0_i32, %c0_i32_0 : i32, i32
  }
  func.func @transform_5(%arg0: i32, %arg1: i32) -> (i32, i32) {
    %c0_i32 = arith.constant 0 : i32
    %c0_i32_0 = arith.constant 0 : i32
    %c0_i32_1 = arith.constant 0 : i32
    return %c0_i32, %c0_i32_0 : i32, i32
  }
  func.func @transform_6(%arg0: i32, %arg1: i32) -> (i32, i32) {
    %c0_i32 = arith.constant 0 : i32
    %c0_i32_0 = arith.constant 0 : i32
    return %arg1, %c0_i32 : i32, i32
  }
}

</mosaic_0001>

<bundles_post_ra>
// kernel: graphnn_forward.1
= control target key start
LH: loop header
LB: loop body
LE: loop exit
PB: predicated region body
PF: predicated region fallthrough
CT: control target
= control target key end

     0   :  { %s1607_s21 = smov 0   ;;  %s1609_s22 = smov 0   ;;  %s1908_s0 = inlined_call_operand.vmem [shape: bf16[128,128], index: 0, kind: input, shape index: {}]   ;;  %s1909_s1 = inlined_call_operand.vmem [shape: bf16[128,128], index: 1, kind: input, shape index: {}]   ;;  %s1910_s2 = inlined_call_operand.vmem [shape: f32[128,128], index: 2, kind: input, shape index: {}]   ;;  %s1911_s3 = inlined_call_operand.vmem [shape: f32[1,128], index: 3, kind: input, shape index: {}]   ;;  %s1912_s4 = inlined_call_operand.vmem [shape: f32[128,128], index: 4, kind: input, shape index: {}]   ;;  %s1913_s5 = inlined_call_operand.vmem [shape: f32[1,128], index: 5, kind: input, shape index: {}]   ;;  %s1914_s6 = inlined_call_operand.vmem [shape: f32[128,128], index: 6, kind: output, shape index: {}]  }
   0x1   :  { %s1611_s23 = smov 0  }
   0x2 LB: > { %s28_s24 = sadd.s32 1, %s1565_s22  ;;  %p1129_p0 = scmp.ge.s32.totalorder %s1569_s23, 1  ;;  %s1569_s23 = sphi %s1611_s23, %s16_s23   ;;  %s1565_s22 = sphi %s1609_s22, %s1916_s22   ;;  %s1561_s21 = sphi %s1607_s21, %s1915_s21  }
   0x3   : > { %p30_p1 = scmp.ge.s32.totalorder %s28_s24, 2  ;;  %p225_p2 = scmp.lt.s32.totalorder %s1569_s23, 3 }
   0x5   : > { %s1918_s24 = smov (%p30_p1, %s28_s24), 0  ;;  %p226_p3 = pnand %p1129_p0, %p225_p2 }
   0x6   : > { %p1130_p4 = scmp.ne.s32.totalorder (!%p226_p3), %s1561_s21, 0 }
   0x7   : > { %229 = sbr.rel (%p226_p3) target bundleno = 1001 (0x3e9), region = 44 }
   0xe   : > { %271 = sbr.rel (%p1130_p4) target bundleno = 508 (0x1fc), region = 48  ;;  %v1523_v0 = vld [vmem:[%s1909_s1] sm:$0xff] (!%p1130_p4)   ;;  %v1524_v1 = vld [vmem:[%s1909_s1 + $0x8] sm:$0xff] (!%p1130_p4)   ;;  %v1525_v2 = vld [vmem:[%s1909_s1 + $0x10] sm:$0xff] (!%p1130_p4)   ;;  %v1571_v56 = vmov (!%p1130_p4), 0.0  }
   0xf   : > { %1258 = vmatprep.subr.bf16.mxu0 (!%p1130_p4), %v1523_v0  ;;  %v1526_v3 = vld [vmem:[%s1909_s1 + $0x18] sm:$0xff] (!%p1130_p4)   ;;  %v1531_v4 = vld [vmem:[%s1908_s0] sm:$0xff] (!%p1130_p4)   ;;  %v1528_v6 = vld [vmem:[%s1909_s1 + $0x28] sm:$0xff] (!%p1130_p4)   ;;  %686 = vst [vmem:[%s1914_s6] sm:$0xff] (!%p1130_p4), %v1571_v56 }
  0x10   : > { %1259 = vmatpush3.bf16.msra.mxu0 (!%p1130_p4), %v1523_v0  ;;  %1274 = vmatprep.mubr.bf16.mxu0 (!%p1130_p4), %v1531_v4  ;;  %v1527_v5 = vld [vmem:[%s1909_s1 + $0x20] sm:$0xff] (!%p1130_p4)   ;;  %v498_v8 = vld [vmem:[%s1910_s2 + $0x8] sm:$0xff] (!%p1130_p4)  ;;  %v499_v9 = vld [vmem:[%s1910_s2 + $0x10] sm:$0xff] (!%p1130_p4)  ;;  %687 = vst [vmem:[%s1914_s6 + $0x8] sm:$0xff] (!%p1130_p4), %v1571_v56 }
  0x11   : > { %1260 = vmatprep.subr.bf16.mxu0 (!%p1130_p4), %v1524_v1  ;;  %v497_v7 = vld [vmem:[%s1910_s2] sm:$0xff] (!%p1130_p4)  ;;  %v500_v11 = vld [vmem:[%s1910_s2 + $0x18] sm:$0xff] (!%p1130_p4)  ;;  %v502_v14 = vld [vmem:[%s1910_s2 + $0x28] sm:$0xff] (!%p1130_p4)  ;;  %688 = vst [vmem:[%s1914_s6 + $0x10] sm:$0xff] (!%p1130_p4), %v1571_v56 }
  0x12   : > { %v1434_v10 = vpack.c.bf16 (!%p1130_p4), %v498_v8, %v497_v7  ;;  %v1438_v12 = vpack.c.bf16 (!%p1130_p4), %v500_v11, %v499_v9  ;;  %v501_v13 = vld [vmem:[%s1910_s2 + $0x20] sm:$0xff] (!%p1130_p4)  ;;  %v1529_v15 = vld [vmem:[%s1909_s1 + $0x30] sm:$0xff] (!%p1130_p4)   ;;  %v504_v18 = vld [vmem:[%s1910_s2 + $0x38] sm:$0xff] (!%p1130_p4)  ;;  %689 = vst [vmem:[%s1914_s6 + $0x18] sm:$0xff] (!%p1130_p4), %v1571_v56 }
  0x13   : > { %v1442_v16 = vpack.c.bf16 (!%p1130_p4), %v502_v14, %v501_v13  ;;  %v503_v17 = vld [vmem:[%s1910_s2 + $0x30] sm:$0xff] (!%p1130_p4)  ;;  %v1530_v19 = vld [vmem:[%s1909_s1 + $0x38] sm:$0xff] (!%p1130_p4)   ;;  %v505_v21 = vld [vmem:[%s1910_s2 + $0x40] sm:$0xff] (!%p1130_p4)  ;;  %690 = vst [vmem:[%s1914_s6 + $0x20] sm:$0xff] (!%p1130_p4), %v1571_v56 }
  0x14   : > { %1261 = vmatpush3.bf16.msra.mxu0 (!%p1130_p4), %v1524_v1  ;;  %1435 = vmatprep.subr.bf16.mxu1 (!%p1130_p4), %v1434_v10  ;;  %v1446_v20 = vpack.c.bf16 (!%p1130_p4), %v504_v18, %v503_v17  ;;  %v506_v22 = vld [vmem:[%s1910_s2 + $0x48] sm:$0xff] (!%p1130_p4)  ;;  %v507_v25 = vld [vmem:[%s1910_s2 + $0x50] sm:$0xff] (!%p1130_p4)  ;;  %v508_v26 = vld [vmem:[%s1910_s2 + $0x58] sm:$0xff] (!%p1130_p4)  ;;  %691 = vst [vmem:[%s1914_s6 + $0x28] sm:$0xff] (!%p1130_p4), %v1571_v56 }
  0x15   : > { %1262 = vmatprep.subr.bf16.mxu0 %v1525_v2  ;;  %1437 = vmatpush3.bf16.msra.mxu1 %v1434_v10  ;;  %v1450_v23 = vpack.c.bf16 %v506_v22, %v505_v21  ;;  %v1532_v24 = vld [vmem:[%s1908_s0 + $0x8] sm:$0xff]   ;;  %v1533_v27 = vld [vmem:[%s1908_s0 + $0x10] sm:$0xff]   ;;  %v1454_v28 = vpack.c.bf16 %v508_v26, %v507_v25  ;;  %v509_v29 = vld [vmem:[%s1910_s2 + $0x60] sm:$0xff]  ;;  %692 = vst [vmem:[%s1914_s6 + $0x30] sm:$0xff] %v1571_v56 }
  0x16   : > { %1439 = vmatprep.subr.bf16.mxu1 %v1438_v12  ;;  %v510_v30 = vld [vmem:[%s1910_s2 + $0x68] sm:$0xff]  ;;  %v1534_v32 = vld [vmem:[%s1908_s0 + $0x18] sm:$0xff]   ;;  %v1535_v33 = vld [vmem:[%s1908_s0 + $0x20] sm:$0xff]   ;;  %693 = vst [vmem:[%s1914_s6 + $0x38] sm:$0xff] %v1571_v56 }
  0x17   : > { %v1458_v31 = vpack.c.bf16 %v510_v30, %v509_v29  ;;  %v1536_v34 = vld [vmem:[%s1908_s0 + $0x28] sm:$0xff]   ;;  %v1537_v35 = vld [vmem:[%s1908_s0 + $0x30] sm:$0xff]   ;;  %v1538_v36 = vld [vmem:[%s1908_s0 + $0x38] sm:$0xff]   ;;  %694 = vst [vmem:[%s1914_s6 + $0x40] sm:$0xff] %v1571_v56 }
  0x18   : > { %1263 = vmatpush3.bf16.msra.mxu0 %v1525_v2  ;;  %v511_v37 = vld [vmem:[%s1910_s2 + $0x70] sm:$0xff]  ;;  %v512_v38 = vld [vmem:[%s1910_s2 + $0x78] sm:$0xff]  ;;  %695 = vst [vmem:[%s1914_s6 + $0x48] sm:$0xff] %v1571_v56  ;;  %696 = vst [vmem:[%s1914_s6 + $0x50] sm:$0xff] %v1571_v56 }
  0x19   : > { %1264 = vmatprep.subr.bf16.mxu0 %v1526_v3  ;;  %1441 = vmatpush3.bf16.msra.mxu1 %v1438_v12  ;;  %v1462_v39 = vpack.c.bf16 %v512_v38, %v511_v37  ;;  %697 = vst [vmem:[%s1914_s6 + $0x58] sm:$0xff] %v1571_v56  ;;  %698 = vst [vmem:[%s1914_s6 + $0x60] sm:$0xff] %v1571_v56  ;;  %v1147_v57 = vld [vmem:[%s1911_s3] ss:$0 sm:$0xff] }
  0x1a   : > { %1443 = vmatprep.subr.bf16.mxu1 %v1442_v16  ;;  %699 = vst [vmem:[%s1914_s6 + $0x68] sm:$0xff] %v1571_v56  ;;  %700 = vst [vmem:[%s1914_s6 + $0x70] sm:$0xff] %v1571_v56 }
  0x1b   : > { %701 = vst [vmem:[%s1914_s6 + $0x78] sm:$0xff] %v1571_v56 }
  0x1c   : > { %1265 = vmatpush3.bf16.msra.mxu0 %v1526_v3 }
  0x1d   : > { %1266 = vmatprep.subr.bf16.mxu0 %v1527_v5  ;;  %1445 = vmatpush3.bf16.msra.mxu1 %v1442_v16 }
  0x1e   : > { %1447 = vmatprep.subr.bf16.mxu1 %v1446_v20 }
  0x20   : > { %1267 = vmatpush3.bf16.msra.mxu0 %v1527_v5 }
  0x21   : > { %1268 = vmatprep.subr.bf16.mxu0 %v1528_v6  ;;  %1449 = vmatpush3.bf16.msra.mxu1 %v1446_v20 }
  0x22   : > { %1451 = vmatprep.subr.bf16.mxu1 %v1450_v23 }
  0x24   : > { %1269 = vmatpush3.bf16.msra.mxu0 %v1528_v6 }
  0x25   : > { %1270 = vmatprep.subr.bf16.mxu0 %v1529_v15  ;;  %1453 = vmatpush3.bf16.msra.mxu1 %v1450_v23 }
  0x26   : > { %1455 = vmatprep.subr.bf16.mxu1 %v1454_v28 }
  0x28   : > { %1271 = vmatpush3.bf16.msra.mxu0 %v1529_v15 }
  0x29   : > { %1272 = vmatprep.subr.bf16.mxu0 %v1530_v19  ;;  %1457 = vmatpush3.bf16.msra.mxu1 %v1454_v28 }
  0x2a   : > { %1459 = vmatprep.subr.bf16.mxu1 %v1458_v31 }
  0x2c   : > { %1273 = vmatpush3.bf16.msra.mxu0 %v1530_v19 }
  0x2d   : > { %1461 = vmatpush3.bf16.msra.mxu1 %v1458_v31 }
  0x2e   : > { %1463 = vmatprep.subr.bf16.mxu1 %v1462_v39 }
  0x2f   : > { %1275 = vmatmul.mubr.bf16.vlgmr.msra.gmra.mrb[0].mxu0 %v1532_v24 }
  0x30   : > { %1278 = vmatprep.mubr.bf16.mxu0 %v1533_v27 }
  0x31   : > { %1465 = vmatpush3.bf16.msra.mxu1 %v1462_v39 }
  0x37   : > { %1279 = vmatmul.mubr.bf16.gmra.mrb[4].mxu0 %v1534_v32 }
  0x38   : > { %1282 = vmatprep.mubr.bf16.mxu0 %v1535_v33 }
  0x3f   : > { %1283 = vmatmul.mubr.bf16.gmra.mrb[8].mxu0 %v1536_v34 }
  0x40   : > { %1286 = vmatprep.mubr.bf16.mxu0 %v1537_v35 }
  0x47   : > { %1287 = vmatmul.mubr.bf16.gmra.mrb[12].mxu0 %v1538_v36 }
 0x102   : > { %v1276_v40 = vpop.f32.mrb[0].mxu0 }
 0x103   : > { %v434_v41 = vpop.f32.mrb[1].mxu0 }
 0x104   : > { %v1277_v42 = vpop.f32.mrb[2].mxu0  ;;  %1322 = vmatprep.mubr.f32.mxu1 %v434_v41 }
 0x105   : > { %v437_v43 = vpop.f32.mrb[3].mxu0 }
 0x106   : > { %1323 = vmatmul.mubr.f32.vlgmr.msra.gmra.mrb[0].mxu1 %v437_v43 }
 0x107   : > { %1325 = vmatprep.mubr.f32.mxu1 %v1276_v40 }
 0x10a   : > { %v1280_v44 = vpop.f32.mrb[4].mxu0  ;;  %1326 = vmatmul.mubr.f32.gmra.mrb[2].mxu1 %v1277_v42 }
 0x10b   : > { %v450_v45 = vpop.f32.mrb[5].mxu0 }
 0x10c   : > { %v1281_v46 = vpop.f32.mrb[6].mxu0  ;;  %1328 = vmatprep.mubr.f32.mxu1 %v450_v45 }
 0x10d   : > { %v453_v47 = vpop.f32.mrb[7].mxu0 }
 0x10e   : > { %1329 = vmatmul.mubr.f32.gmra.mrb[4].mxu1 %v453_v47 }
 0x10f   : > { %1331 = vmatprep.mubr.f32.mxu1 %v1280_v44 }
 0x112   : > { %v1284_v48 = vpop.f32.mrb[8].mxu0  ;;  %1332 = vmatmul.mubr.f32.gmra.mrb[6].mxu1 %v1281_v46 }
 0x113   : > { %v466_v49 = vpop.f32.mrb[9].mxu0 }
 0x114   : > { %v1285_v50 = vpop.f32.mrb[10].mxu0  ;;  %1334 = vmatprep.mubr.f32.mxu1 %v466_v49 }
 0x115   : > { %v469_v51 = vpop.f32.mrb[11].mxu0 }
 0x116   : > { %1335 = vmatmul.mubr.f32.gmra.mrb[8].mxu1 %v469_v51 }
 0x117   : > { %1337 = vmatprep.mubr.f32.mxu1 %v1284_v48 }
 0x11a   : > { %v1288_v52 = vpop.f32.mrb[12].mxu0  ;;  %1338 = vmatmul.mubr.f32.gmra.mrb[10].mxu1 %v1285_v50 }
 0x11b   : > { %v482_v53 = vpop.f32.mrb[13].mxu0 }
 0x11c   : > { %v1289_v54 = vpop.f32.mrb[14].mxu0  ;;  %1340 = vmatprep.mubr.f32.mxu1 %v482_v53 }
 0x11d   : > { %v485_v55 = vpop.f32.mrb[15].mxu0 }
 0x11e   : > { %1341 = vmatmul.mubr.f32.gmra.mrb[12].mxu1 %v485_v55 }
 0x11f   : > { %1343 = vmatprep.mubr.f32.mxu1 %v1288_v52 }
 0x122   : > { %1344 = vmatmul.mubr.f32.gmra.mrb[14].mxu1 %v1289_v54 }
 0x1d9   : > { %v1324_v58 = vpop.f32.mrb[0].mxu1 }
 0x1da   : > { %v592_v59 = vadd.f32 %v1324_v58, %v1147_v57  ;;  %v586_v60 = vpop.f32.mrb[1].mxu1 }
 0x1db   : > { %v587_v61 = vadd.f32 %v1147_v57, %v586_v60 }
 0x1dd   : > { %v666_v62 = vpack.c.bf16 %v592_v59, %v587_v61  ;;  %v1327_v63 = vpop.f32.mrb[2].mxu1 }
 0x1de   : > { %v602_v0 = vadd.f32 %v1327_v63, %v1147_v57  ;;  %v596_v1 = vpop.f32.mrb[3].mxu1 }
 0x1df   : > { %678 = vst [vmem:[#allocation2] sm:$0xff] %v666_v62  ;;  %v597_v2 = vadd.f32 %v1147_v57, %v596_v1 }
 0x1e1   : > { %v667_v3 = vpack.c.bf16 %v602_v0, %v597_v2  ;;  %v1330_v4 = vpop.f32.mrb[4].mxu1 }
 0x1e2   : > { %v612_v5 = vadd.f32 %v1330_v4, %v1147_v57  ;;  %v606_v6 = vpop.f32.mrb[5].mxu1 }
 0x1e3   : > { %679 = vst [vmem:[#allocation2 + $0x8] sm:$0xff] %v667_v3  ;;  %v607_v7 = vadd.f32 %v1147_v57, %v606_v6 }
 0x1e5   : > { %v668_v8 = vpack.c.bf16 %v612_v5, %v607_v7  ;;  %v1333_v9 = vpop.f32.mrb[6].mxu1 }
 0x1e6   : > { %v622_v10 = vadd.f32 %v1333_v9, %v1147_v57  ;;  %v616_v11 = vpop.f32.mrb[7].mxu1 }
 0x1e7   : > { %680 = vst [vmem:[#allocation2 + $0x10] sm:$0xff] %v668_v8  ;;  %v617_v12 = vadd.f32 %v1147_v57, %v616_v11 }
 0x1e9   : > { %v669_v13 = vpack.c.bf16 %v622_v10, %v617_v12  ;;  %v1336_v14 = vpop.f32.mrb[8].mxu1 }
 0x1ea   : > { %v632_v15 = vadd.f32 %v1336_v14, %v1147_v57  ;;  %v626_v16 = vpop.f32.mrb[9].mxu1 }
 0x1eb   : > { %681 = vst [vmem:[#allocation2 + $0x18] sm:$0xff] %v669_v13  ;;  %v627_v17 = vadd.f32 %v1147_v57, %v626_v16 }
 0x1ed   : > { %v670_v18 = vpack.c.bf16 %v632_v15, %v627_v17  ;;  %v1339_v19 = vpop.f32.mrb[10].mxu1 }
 0x1ee   : > { %v642_v20 = vadd.f32 %v1339_v19, %v1147_v57  ;;  %v636_v21 = vpop.f32.mrb[11].mxu1 }
 0x1ef   : > { %682 = vst [vmem:[#allocation2 + $0x20] sm:$0xff] %v670_v18  ;;  %v637_v22 = vadd.f32 %v1147_v57, %v636_v21 }
 0x1f1   : > { %v671_v23 = vpack.c.bf16 %v642_v20, %v637_v22  ;;  %v1342_v24 = vpop.f32.mrb[12].mxu1 }
 0x1f2   : > { %v652_v25 = vadd.f32 %v1342_v24, %v1147_v57  ;;  %v646_v26 = vpop.f32.mrb[13].mxu1 }
 0x1f3   : > { %683 = vst [vmem:[#allocation2 + $0x28] sm:$0xff] %v671_v23  ;;  %v647_v27 = vadd.f32 %v1147_v57, %v646_v26 }
 0x1f5   : > { %v672_v28 = vpack.c.bf16 %v652_v25, %v647_v27  ;;  %v1345_v29 = vpop.f32.mrb[14].mxu1 }
 0x1f6   : > { %v662_v30 = vadd.f32 %v1345_v29, %v1147_v57  ;;  %v656_v31 = vpop.f32.mrb[15].mxu1 }
 0x1f7   : > { %684 = vst [vmem:[#allocation2 + $0x30] sm:$0xff] %v672_v28  ;;  %v657_v32 = vadd.f32 %v1147_v57, %v656_v31 }
 0x1f9   : > { %v673_v33 = vpack.c.bf16 %v662_v30, %v657_v32 }
 0x1fb   : > { %685 = vst [vmem:[#allocation2 + $0x38] sm:$0xff] %v673_v33 }
 0x1fc PF: > { %p1148_p5 = scmp.ne.s32.totalorder %s1561_s21, 1 }
 0x1fd   : > { %v722_v34 = vld [vmem:[#allocation2] sm:$0xff] (!%p1148_p5)  ;;  %v723_v35 = vld [vmem:[#allocation2 + $0x8] sm:$0xff] (!%p1148_p5)  ;;  %v724_v37 = vld [vmem:[#allocation2 + $0x10] sm:$0xff] (!%p1148_p5) }
 0x1fe   : > { %705 = sbr.rel (%p1148_p5) target bundleno = 1001 (0x3e9), region = 52  ;;  %1346 = vmatprep.subr.bf16.mxu0 (!%p1148_p5), %v722_v34  ;;  %v1539_v36 = vld [vmem:[%s1908_s0] sm:$0xff] (!%p1148_p5)   ;;  %v725_v38 = vld [vmem:[#allocation2 + $0x18] sm:$0xff] (!%p1148_p5)  ;;  %v876_v40 = vld [vmem:[%s1912_s4 + $0x8] sm:$0xff] (!%p1148_p5) }
 0x1ff   : > { %1347 = vmatpush3.bf16.msra.mxu0 (!%p1148_p5), %v722_v34  ;;  %1362 = vmatprep.mubr.bf16.mxu0 (!%p1148_p5), %v1539_v36  ;;  %v875_v39 = vld [vmem:[%s1912_s4] sm:$0xff] (!%p1148_p5)  ;;  %v877_v41 = vld [vmem:[%s1912_s4 + $0x10] sm:$0xff] (!%p1148_p5)  ;;  %v878_v42 = vld [vmem:[%s1912_s4 + $0x18] sm:$0xff] (!%p1148_p5) }
 0x200   : > { %1348 = vmatprep.subr.bf16.mxu0 (!%p1148_p5), %v723_v35  ;;  %v726_v43 = vld [vmem:[#allocation2 + $0x20] sm:$0xff] (!%p1148_p5)  ;;  %v1466_v44 = vpack.c.bf16 (!%p1148_p5), %v876_v40, %v875_v39  ;;  %v1470_v45 = vpack.c.bf16 (!%p1148_p5), %v878_v42, %v877_v41  ;;  %v880_v47 = vld [vmem:[%s1912_s4 + $0x28] sm:$0xff] (!%p1148_p5)  ;;  %v881_v50 = vld [vmem:[%s1912_s4 + $0x30] sm:$0xff] (!%p1148_p5) }
 0x201   : > { %v879_v46 = vld [vmem:[%s1912_s4 + $0x20] sm:$0xff] (!%p1148_p5)  ;;  %v727_v48 = vld [vmem:[#allocation2 + $0x28] sm:$0xff] (!%p1148_p5)  ;;  %v882_v51 = vld [vmem:[%s1912_s4 + $0x38] sm:$0xff] (!%p1148_p5) }
 0x202   : > { %1467 = vmatprep.subr.bf16.mxu1 (!%p1148_p5), %v1466_v44  ;;  %v1474_v49 = vpack.c.bf16 (!%p1148_p5), %v880_v47, %v879_v46  ;;  %v728_v52 = vld [vmem:[#allocation2 + $0x30] sm:$0xff] (!%p1148_p5)  ;;  %v1478_v53 = vpack.c.bf16 (!%p1148_p5), %v882_v51, %v881_v50  ;;  %v883_v54 = vld [vmem:[%s1912_s4 + $0x40] sm:$0xff] (!%p1148_p5)  ;;  %v884_v55 = vld [vmem:[%s1912_s4 + $0x48] sm:$0xff] (!%p1148_p5) }
 0x203   : > { %1349 = vmatpush3.bf16.msra.mxu0 (!%p1148_p5), %v723_v35  ;;  %1469 = vmatpush3.bf16.msra.mxu1 (!%p1148_p5), %v1466_v44  ;;  %v729_v56 = vld [vmem:[#allocation2 + $0x38] sm:$0xff] (!%p1148_p5)  ;;  %v1482_v57 = vpack.c.bf16 (!%p1148_p5), %v884_v55, %v883_v54  ;;  %v885_v58 = vld [vmem:[%s1912_s4 + $0x50] sm:$0xff] (!%p1148_p5)  ;;  %v1540_v61 = vld [vmem:[%s1908_s0 + $0x8] sm:$0xff] (!%p1148_p5)  }
 0x204   : > { %1350 = vmatprep.subr.bf16.mxu0 (!%p1148_p5), %v724_v37  ;;  %1471 = vmatprep.subr.bf16.mxu1 (!%p1148_p5), %v1470_v45  ;;  %v886_v59 = vld [vmem:[%s1912_s4 + $0x58] sm:$0xff] (!%p1148_p5)  ;;  %v887_v62 = vld [vmem:[%s1912_s4 + $0x60] sm:$0xff] (!%p1148_p5)  ;;  %v888_v63 = vld [vmem:[%s1912_s4 + $0x68] sm:$0xff] (!%p1148_p5) }
 0x205   : > { %v1486_v60 = vpack.c.bf16 %v886_v59, %v885_v58  ;;  %v1541_v0 = vld [vmem:[%s1908_s0 + $0x10] sm:$0xff]   ;;  %v1490_v1 = vpack.c.bf16 %v888_v63, %v887_v62  ;;  %v1542_v2 = vld [vmem:[%s1908_s0 + $0x18] sm:$0xff]   ;;  %v1543_v3 = vld [vmem:[%s1908_s0 + $0x20] sm:$0xff]  }
 0x206   : > { %v1544_v4 = vld [vmem:[%s1908_s0 + $0x28] sm:$0xff]   ;;  %v1545_v5 = vld [vmem:[%s1908_s0 + $0x30] sm:$0xff]   ;;  %v1546_v6 = vld [vmem:[%s1908_s0 + $0x38] sm:$0xff]  }
 0x207   : > { %1351 = vmatpush3.bf16.msra.mxu0 %v724_v37  ;;  %1473 = vmatpush3.bf16.msra.mxu1 %v1470_v45  ;;  %v889_v7 = vld [vmem:[%s1912_s4 + $0x70] sm:$0xff]  ;;  %v890_v8 = vld [vmem:[%s1912_s4 + $0x78] sm:$0xff]  ;;  %v1157_v26 = vld [vmem:[%s1913_s5] ss:$0 sm:$0xff] }
 0x208   : > { %1352 = vmatprep.subr.bf16.mxu0 %v725_v38  ;;  %1475 = vmatprep.subr.bf16.mxu1 %v1474_v49  ;;  %v1494_v9 = vpack.c.bf16 %v890_v8, %v889_v7 }
 0x20b   : > { %1353 = vmatpush3.bf16.msra.mxu0 %v725_v38  ;;  %1477 = vmatpush3.bf16.msra.mxu1 %v1474_v49 }
 0x20c   : > { %1354 = vmatprep.subr.bf16.mxu0 %v726_v43  ;;  %1479 = vmatprep.subr.bf16.mxu1 %v1478_v53 }
 0x20f   : > { %1355 = vmatpush3.bf16.msra.mxu0 %v726_v43  ;;  %1481 = vmatpush3.bf16.msra.mxu1 %v1478_v53 }
 0x210   : > { %1356 = vmatprep.subr.bf16.mxu0 %v727_v48  ;;  %1483 = vmatprep.subr.bf16.mxu1 %v1482_v57 }
 0x213   : > { %1357 = vmatpush3.bf16.msra.mxu0 %v727_v48  ;;  %1485 = vmatpush3.bf16.msra.mxu1 %v1482_v57 }
 0x214   : > { %1358 = vmatprep.subr.bf16.mxu0 %v728_v52  ;;  %1487 = vmatprep.subr.bf16.mxu1 %v1486_v60 }
 0x217   : > { %1359 = vmatpush3.bf16.msra.mxu0 %v728_v52  ;;  %1489 = vmatpush3.bf16.msra.mxu1 %v1486_v60 }
 0x218   : > { %1360 = vmatprep.subr.bf16.mxu0 %v729_v56  ;;  %1491 = vmatprep.subr.bf16.mxu1 %v1490_v1 }
 0x21b   : > { %1361 = vmatpush3.bf16.msra.mxu0 %v729_v56  ;;  %1493 = vmatpush3.bf16.msra.mxu1 %v1490_v1 }
 0x21c   : > { %1495 = vmatprep.subr.bf16.mxu1 %v1494_v9 }
 0x21e   : > { %1363 = vmatmul.mubr.bf16.vlgmr.msra.gmra.mrb[0].mxu0 %v1540_v61 }
 0x21f   : > { %1366 = vmatprep.mubr.bf16.mxu0 %v1541_v0  ;;  %1497 = vmatpush3.bf16.msra.mxu1 %v1494_v9 }
 0x226   : > { %1367 = vmatmul.mubr.bf16.gmra.mrb[4].mxu0 %v1542_v2 }
 0x227   : > { %1370 = vmatprep.mubr.bf16.mxu0 %v1543_v3 }
 0x22e   : > { %1371 = vmatmul.mubr.bf16.gmra.mrb[8].mxu0 %v1544_v4 }
 0x22f   : > { %1374 = vmatprep.mubr.bf16.mxu0 %v1545_v5 }
 0x236   : > { %1375 = vmatmul.mubr.bf16.gmra.mrb[12].mxu0 %v1546_v6 }
 0x2f1   : > { %v1364_v10 = vpop.f32.mrb[0].mxu0 }
 0x2f2   : > { %v812_v11 = vpop.f32.mrb[1].mxu0 }
 0x2f3   : > { %v1365_v12 = vpop.f32.mrb[2].mxu0  ;;  %1410 = vmatprep.mubr.f32.mxu1 %v812_v11 }
 0x2f4   : > { %v815_v13 = vpop.f32.mrb[3].mxu0 }
 0x2f5   : > { %1411 = vmatmul.mubr.f32.vlgmr.msra.gmra.mrb[0].mxu1 %v815_v13 }
 0x2f6   : > { %1413 = vmatprep.mubr.f32.mxu1 %v1364_v10 }
 0x2f9   : > { %v1368_v14 = vpop.f32.mrb[4].mxu0  ;;  %1414 = vmatmul.mubr.f32.gmra.mrb[2].mxu1 %v1365_v12 }
 0x2fa   : > { %v828_v15 = vpop.f32.mrb[5].mxu0 }
 0x2fb   : > { %v1369_v16 = vpop.f32.mrb[6].mxu0  ;;  %1416 = vmatprep.mubr.f32.mxu1 %v828_v15 }
 0x2fc   : > { %v831_v17 = vpop.f32.mrb[7].mxu0 }
 0x2fd   : > { %1417 = vmatmul.mubr.f32.gmra.mrb[4].mxu1 %v831_v17 }
 0x2fe   : > { %1419 = vmatprep.mubr.f32.mxu1 %v1368_v14 }
 0x301   : > { %v1372_v18 = vpop.f32.mrb[8].mxu0  ;;  %1420 = vmatmul.mubr.f32.gmra.mrb[6].mxu1 %v1369_v16 }
 0x302   : > { %v844_v19 = vpop.f32.mrb[9].mxu0 }
 0x303   : > { %v1373_v20 = vpop.f32.mrb[10].mxu0  ;;  %1422 = vmatprep.mubr.f32.mxu1 %v844_v19 }
 0x304   : > { %v847_v21 = vpop.f32.mrb[11].mxu0 }
 0x305   : > { %1423 = vmatmul.mubr.f32.gmra.mrb[8].mxu1 %v847_v21 }
 0x306   : > { %1425 = vmatprep.mubr.f32.mxu1 %v1372_v18 }
 0x309   : > { %v1376_v22 = vpop.f32.mrb[12].mxu0  ;;  %1426 = vmatmul.mubr.f32.gmra.mrb[10].mxu1 %v1373_v20 }
 0x30a   : > { %v860_v23 = vpop.f32.mrb[13].mxu0 }
 0x30b   : > { %v1377_v24 = vpop.f32.mrb[14].mxu0  ;;  %1428 = vmatprep.mubr.f32.mxu1 %v860_v23 }
 0x30c   : > { %v863_v25 = vpop.f32.mrb[15].mxu0 }
 0x30d   : > { %1429 = vmatmul.mubr.f32.gmra.mrb[12].mxu1 %v863_v25 }
 0x30e   : > { %1431 = vmatprep.mubr.f32.mxu1 %v1376_v22 }
 0x311   : > { %1432 = vmatmul.mubr.f32.gmra.mrb[14].mxu1 %v1377_v24 }
 0x3c8   : > { %v1412_v27 = vpop.f32.mrb[0].mxu1 }
 0x3c9   : > { %v970_v28 = vadd.f32 %v1412_v27, %v1157_v26  ;;  %v964_v29 = vpop.f32.mrb[1].mxu1 }
 0x3ca   : > { %v965_v30 = vadd.f32 %v1157_v26, %v964_v29 }
 0x3cb   : > { %1044 = vst [vmem:[%s1914_s6 + $0x8] sm:$0xff] %v970_v28 }
 0x3cc   : > { %1043 = vst [vmem:[%s1914_s6] sm:$0xff] %v965_v30  ;;  %v1415_v31 = vpop.f32.mrb[2].mxu1 }
 0x3cd   : > { %v980_v32 = vadd.f32 %v1415_v31, %v1157_v26  ;;  %v974_v33 = vpop.f32.mrb[3].mxu1 }
 0x3ce   : > { %v975_v34 = vadd.f32 %v1157_v26, %v974_v33 }
 0x3cf   : > { %1046 = vst [vmem:[%s1914_s6 + $0x18] sm:$0xff] %v980_v32 }
 0x3d0   : > { %1045 = vst [vmem:[%s1914_s6 + $0x10] sm:$0xff] %v975_v34  ;;  %v1418_v35 = vpop.f32.mrb[4].mxu1 }
 0x3d1   : > { %v990_v36 = vadd.f32 %v1418_v35, %v1157_v26  ;;  %v984_v37 = vpop.f32.mrb[5].mxu1 }
 0x3d2   : > { %v985_v38 = vadd.f32 %v1157_v26, %v984_v37 }
 0x3d3   : > { %1048 = vst [vmem:[%s1914_s6 + $0x28] sm:$0xff] %v990_v36 }
 0x3d4   : > { %1047 = vst [vmem:[%s1914_s6 + $0x20] sm:$0xff] %v985_v38  ;;  %v1421_v39 = vpop.f32.mrb[6].mxu1 }
 0x3d5   : > { %v1000_v40 = vadd.f32 %v1421_v39, %v1157_v26  ;;  %v994_v41 = vpop.f32.mrb[7].mxu1 }
 0x3d6   : > { %v995_v42 = vadd.f32 %v1157_v26, %v994_v41 }
 0x3d7   : > { %1050 = vst [vmem:[%s1914_s6 + $0x38] sm:$0xff] %v1000_v40 }
 0x3d8   : > { %1049 = vst [vmem:[%s1914_s6 + $0x30] sm:$0xff] %v995_v42  ;;  %v1424_v43 = vpop.f32.mrb[8].mxu1 }
 0x3d9   : > { %v1010_v44 = vadd.f32 %v1424_v43, %v1157_v26  ;;  %v1004_v45 = vpop.f32.mrb[9].mxu1 }
 0x3da   : > { %v1005_v46 = vadd.f32 %v1157_v26, %v1004_v45 }
 0x3db   : > { %1052 = vst [vmem:[%s1914_s6 + $0x48] sm:$0xff] %v1010_v44 }
 0x3dc   : > { %1051 = vst [vmem:[%s1914_s6 + $0x40] sm:$0xff] %v1005_v46  ;;  %v1427_v47 = vpop.f32.mrb[10].mxu1 }
 0x3dd   : > { %v1020_v48 = vadd.f32 %v1427_v47, %v1157_v26  ;;  %v1014_v49 = vpop.f32.mrb[11].mxu1 }
 0x3de   : > { %v1015_v50 = vadd.f32 %v1157_v26, %v1014_v49 }
 0x3df   : > { %1054 = vst [vmem:[%s1914_s6 + $0x58] sm:$0xff] %v1020_v48 }
 0x3e0   : > { %1053 = vst [vmem:[%s1914_s6 + $0x50] sm:$0xff] %v1015_v50  ;;  %v1430_v51 = vpop.f32.mrb[12].mxu1 }
 0x3e1   : > { %v1030_v52 = vadd.f32 %v1430_v51, %v1157_v26  ;;  %v1024_v53 = vpop.f32.mrb[13].mxu1 }
 0x3e2   : > { %v1025_v54 = vadd.f32 %v1157_v26, %v1024_v53 }
 0x3e3   : > { %1056 = vst [vmem:[%s1914_s6 + $0x68] sm:$0xff] %v1030_v52 }
 0x3e4   : > { %1055 = vst [vmem:[%s1914_s6 + $0x60] sm:$0xff] %v1025_v54  ;;  %v1433_v55 = vpop.f32.mrb[14].mxu1 }
 0x3e5   : > { %v1040_v56 = vadd.f32 %v1433_v55, %v1157_v26  ;;  %v1034_v57 = vpop.f32.mrb[15].mxu1 }
 0x3e6   : > { %v1035_v58 = vadd.f32 %v1157_v26, %v1034_v57 }
 0x3e7   : > { %1058 = vst [vmem:[%s1914_s6 + $0x78] sm:$0xff] %v1040_v56 }
 0x3e8   : > { %1057 = vst [vmem:[%s1914_s6 + $0x70] sm:$0xff] %v1035_v58 }
 0x3e9 PF: > { %s16_s23 = sadd.s32 1, %s1569_s23   ;;  %s1915_s21 = smov %s1565_s22 }
 0x3ea   : > { %p13_p6 = scmp.ge.s32.totalorder %s16_s23, 4   ;;  %s1916_s22 = smov %s1918_s24 }
 0x3ec   :  { %15 = sbr.rel (!%p13_p6) target bundleno = 2 (0x2), region = 83 }

</bundles_post_ra>
